<compile_context>
chip_gen: v7x
topology: tpu7x:2x2x1
jax: 0.10.0
libtpu: 0.0.40
codegen_flags: <defaults>
</compile_context>

<pallas_src>
import functools

import jax
import jax.numpy as jnp
import numpy as np
from jax.experimental import pallas as pl
from jax.experimental.pallas import tpu as pltpu

LAYER_COUNT = 3


# ----------------------------------------------------------------------------
# Activations
# ----------------------------------------------------------------------------
_TANH_CLAMP = 7.90531110763549805
_TANH_P = (-2.76076847742355e-16, 2.00018790482477e-13, -8.60467152213735e-11,
           5.12229709037114e-08, 1.48572235717979e-05, 6.37261928875436e-04,
           4.89352455891786e-03)
_TANH_Q = (1.19825839466702e-06, 1.18534705686654e-04, 2.26843463243900e-03,
           4.89352518554385e-03)


def _rational_tanh_f32(x):
    """Clamped (13/6) rational tanh evaluated on the VPU (|err| ~ 1e-6).

    Useful on v5e where the single EUP slot is the bottleneck while the 4 VALU
    slots are nearly idle."""
    x = jnp.clip(x, -_TANH_CLAMP, _TANH_CLAMP)
    x2 = x * x
    p = jnp.float32(_TANH_P[0])
    for c in _TANH_P[1:]:
        p = p * x2 + jnp.float32(c)
    p = p * x
    q = jnp.float32(_TANH_Q[0])
    for c in _TANH_Q[1:]:
        q = q * x2 + jnp.float32(c)
    return p / q


def _act(u_f32, *, compute_dtype, tanh_impl):
    """tanh of an f32 pre-activation; the result stays in compute_dtype."""
    if tanh_impl == "rational":
        return _rational_tanh_f32(u_f32).astype(compute_dtype)
    if np.dtype(compute_dtype) == np.dtype(jnp.bfloat16):
        # bf16 tanh ~2x EUP throughput on v6e/v7x; h stays bf16 so the next
        # matmul runs natively in bf16 on the MXU (f32 accumulation).
        return jnp.tanh(u_f32.astype(jnp.bfloat16))
    return jnp.tanh(u_f32)


# ----------------------------------------------------------------------------
# Kernel bodies (pixels on the lane axis)
# ----------------------------------------------------------------------------
def _mlp_tail(u, w_mid_ref, b_mid_ref, w_out_ref, b_out_ref, out_ref, *,
              n_mid, compute_dtype, tanh_impl):
    act = functools.partial(_act, compute_dtype=compute_dtype, tanh_impl=tanh_impl)
    h = act(u)                                              # (ch, tile_n)
    for l in range(n_mid):                                  # static unroll (n_mid = 3)
        u = jnp.dot(w_mid_ref[l], h,
                    preferred_element_type=jnp.float32) + b_mid_ref[l]
        h = act(u)
    o = jnp.dot(w_out_ref[...], h,
                preferred_element_type=jnp.float32) + b_out_ref[...]
    # TODO(synk): only the module's default activations (Tanh/Tanh/Sigmoid) are
    # wired in; Sin/Softplus/ReLU/ELU/Modulo variants would slot in here.
    out_ref[...] = jax.nn.sigmoid(o).astype(out_ref.dtype)


def cppn_kernel_shared_z(x_ref, y_ref, r_ref, w_xyr_ref, b_in_ref,
                         w_mid_ref, b_mid_ref, w_out_ref, b_out_ref, out_ref,
                         *, n_mid, compute_dtype, tanh_impl):
    # First layer as VPU broadcast-MACs; the shared latent z has already been
    # folded into b_in by the wrapper so no z traffic reaches the kernel.
    u = (w_xyr_ref[:, 0:1] * x_ref[...]
         + w_xyr_ref[:, 1:2] * y_ref[...]
         + w_xyr_ref[:, 2:3] * r_ref[...]
         + b_in_ref[...])                                   # (ch, tile_n) f32
    _mlp_tail(u, w_mid_ref, b_mid_ref, w_out_ref, b_out_ref, out_ref,
              n_mid=n_mid, compute_dtype=compute_dtype, tanh_impl=tanh_impl)


def cppn_kernel_per_pixel_z(z_ref, x_ref, y_ref, r_ref, w_z_ref, w_xyr_ref,
                            b_in_ref, w_mid_ref, b_mid_ref, w_out_ref,
                            b_out_ref, out_ref,
                            *, n_mid, compute_dtype, tanh_impl):
    u = jnp.dot(w_z_ref[...], z_ref[...], preferred_element_type=jnp.float32)
    u = (u + w_xyr_ref[:, 0:1] * x_ref[...]
           + w_xyr_ref[:, 1:2] * y_ref[...]
           + w_xyr_ref[:, 2:3] * r_ref[...]
           + b_in_ref[...])
    _mlp_tail(u, w_mid_ref, b_mid_ref, w_out_ref, b_out_ref, out_ref,
              n_mid=n_mid, compute_dtype=compute_dtype, tanh_impl=tanh_impl)


# ----------------------------------------------------------------------------
# Parameter packing (PyTorch (out, in) orientation kept)
# ----------------------------------------------------------------------------
def pack_params(p, *, compute_dtype=jnp.float32, z_shared=None):
    n_mid = sum(1 for k in p if k.startswith("w") and k[1:].isdigit())
    f32 = jnp.float32
    w_z = p["wz"].astype(f32)                                                # (ch, dim_z)
    w_xyr = jnp.concatenate([p["wx"], p["wy"], p["wr"]], axis=1).astype(f32)  # (ch, 3)
    if z_shared is not None:
        # Shared latent: fold Wz @ z into the first-layer bias once, wrapper-side.
        b_in = (w_z @ z_shared.astype(f32) + p["bz"].astype(f32))[:, None]   # (ch, 1)
    else:
        b_in = p["bz"].astype(f32)[:, None]
    w_mid = jnp.stack([p[f"w{i}"] for i in range(1, n_mid + 1)]).astype(compute_dtype)
    b_mid = jnp.stack([p[f"b{i}"] for i in range(1, n_mid + 1)])[..., None].astype(f32)
    w_out = p["wo"].astype(compute_dtype)                                    # (dim_c, ch)
    b_out = p["bo"].astype(f32)[:, None]                                     # (dim_c, 1)
    return w_z, w_xyr, b_in, w_mid, b_mid, w_out, b_out


def _choose_tile(n, tile_n):
    """Lane-multiple tile size; keep >= 2 grid steps when N allows so the
    ("parallel",) axis can shard across both v7x TensorCores."""
    req = max(128, (int(tile_n) // 128) * 128)
    half = max(128, pl.cdiv(pl.cdiv(n, 2), 128) * 128)
    return min(req, half)


# ----------------------------------------------------------------------------
# Wrapper
# ----------------------------------------------------------------------------
def cppn_forward(z, x, y, r, params, *, tile_n=8192, compute_dtype=jnp.float32,
                 tanh_impl="exact", out_dtype=jnp.float32, transpose_output=True):
    """CPPN forward.  z may be per-pixel (N, dim_z) or shared ((dim_z,) / (1, dim_z)).

    compute_dtype=jnp.bfloat16 recommended on v6e/v7x (looser numerics);
    tanh_impl="rational" recommended on v5e.  Passing x/y/r as flat (N,) arrays
    avoids a tiny (N,1)->(N,) relayout in the wrapper."""
    x = jnp.asarray(x)
    y = jnp.asarray(y)
    r = jnp.asarray(r)
    z = jnp.asarray(z, jnp.float32)
    N = int(np.prod(x.shape))

    shared_z = (z.ndim == 1) or (z.shape[0] == 1)
    z_vec = z.reshape(-1) if shared_z else None

    w_z, w_xyr, b_in, w_mid, b_mid, w_out, b_out = pack_params(
        params, compute_dtype=compute_dtype, z_shared=z_vec)
    dim_c = w_out.shape[0]
    dim_z = params["wz"].shape[1]
    n_mid = w_mid.shape[0]

    tile = _choose_tile(N, tile_n)
    n_pad = pl.cdiv(N, tile) * tile
    grid = (n_pad // tile,)

    def row(v):
        v = jnp.asarray(v, jnp.float32).reshape(-1)
        if v.shape[0] != n_pad:
            v = jnp.pad(v, (0, n_pad - v.shape[0]))
        return v.reshape(1, n_pad)

    xs, ys, rs = row(x), row(y), row(r)

    def full_spec(a):
        nd = a.ndim
        return pl.BlockSpec(a.shape, lambda i, _nd=nd: (0,) * _nd)

    row_spec = pl.BlockSpec((1, tile), lambda i: (0, i))

    if shared_z:
        kernel = functools.partial(cppn_kernel_shared_z, n_mid=n_mid,
                                   compute_dtype=compute_dtype, tanh_impl=tanh_impl)
        args = (xs, ys, rs, w_xyr, b_in, w_mid, b_mid, w_out, b_out)
        in_specs = [row_spec, row_spec, row_spec] + [full_spec(a) for a in args[3:]]
    else:
        # Per-pixel latents: one small (dim_z*4 B/pixel) relayout pass, then a
        # dense (dim_z, tile) block per grid step.
        z_t = z.T
        if z_t.shape[1] != n_pad:
            z_t = jnp.pad(z_t, ((0, 0), (0, n_pad - z_t.shape[1])))
        kernel = functools.partial(cppn_kernel_per_pixel_z, n_mid=n_mid,
                                   compute_dtype=compute_dtype, tanh_impl=tanh_impl)
        args = (z_t, xs, ys, rs, w_z, w_xyr, b_in, w_mid, b_mid, w_out, b_out)
        in_specs = ([pl.BlockSpec((dim_z, tile), lambda i: (0, i)),
                     row_spec, row_spec, row_spec]
                    + [full_spec(a) for a in args[4:]])

    out_t = pl.pallas_call(
        kernel,
        out_shape=jax.ShapeDtypeStruct((dim_c, n_pad), out_dtype),
        grid_spec=pltpu.PrefetchScalarGridSpec(
            num_scalar_prefetch=0,
            grid=grid,
            in_specs=in_specs,
            out_specs=pl.BlockSpec((dim_c, tile), lambda i: (0, i)),
        ),
        compiler_params=pltpu.CompilerParams(
            dimension_semantics=("parallel",)),
    )(*args)

    out = out_t[:, :N]
    # (dim_c, N) -> (N, dim_c) to match the module; set transpose_output=False
    # to keep the lane-dense channel-major layout and skip this XLA pass.
    return out.T if transpose_output else out


# ----------------------------------------------------------------------------
# Deterministic init matching weights_init defaults:
# weights ~ N(0, 1), biases = 0 (zero_bias=True), PyTorch (out, in) orientation.
# ----------------------------------------------------------------------------
def init_params(key, dim_z, dim_c, ch, layer_count=LAYER_COUNT):
    ks = jax.random.split(key, 5 + layer_count)
    f32 = jnp.float32
    p = {
        "wz": jax.random.normal(ks[0], (ch, dim_z), f32),
        "bz": jnp.zeros((ch,), f32),
        "wx": jax.random.normal(ks[1], (ch, 1), f32),
        "wy": jax.random.normal(ks[2], (ch, 1), f32),
        "wr": jax.random.normal(ks[3], (ch, 1), f32),
        "wo": jax.random.normal(ks[4], (dim_c, ch), f32),
        "bo": jnp.zeros((dim_c,), f32),
    }
    for i in range(layer_count):
        p[f"w{i + 1}"] = jax.random.normal(ks[5 + i], (ch, ch), f32)
        p[f"b{i + 1}"] = jnp.zeros((ch,), f32)
    return p


# Plain-JAX reference (mirrors the PyTorch forward) for correctness checking.
def cppn_reference(z, x, y, r, p):
    n_mid = sum(1 for k in p if k.startswith("w") and k[1:].isdigit())
    u = (z @ p["wz"].T + p["bz"] + x @ p["wx"].T + y @ p["wy"].T + r @ p["wr"].T)
    h = jnp.tanh(u)
    for i in range(1, n_mid + 1):
        h = jnp.tanh(h @ p[f"w{i}"].T + p[f"b{i}"])
    return jax.nn.sigmoid(h @ p["wo"].T + p["bo"])


if __name__ == "__main__":
    dim_z, dim_c, ch = 8, 3, 32
    H = W = 33                      # N = 1089: ragged, multi-step grid at toy size
    N = H * W

    key = jax.random.PRNGKey(0)
    kp, kz, kzp = jax.random.split(key, 3)
    params = init_params(kp, dim_z, dim_c, ch)

    ys_g, xs_g = jnp.meshgrid(jnp.linspace(-1.0, 1.0, H),
                              jnp.linspace(-1.0, 1.0, W), indexing="ij")
    x = xs_g.reshape(N, 1).astype(jnp.float32)
    y = ys_g.reshape(N, 1).astype(jnp.float32)
    r = jnp.sqrt(x * x + y * y)

    # 1) Shared latent z (folded into the first-layer bias), exact f32 path.
    z_shared = jax.random.normal(kz, (1, dim_z), jnp.float32)
    out = jax.block_until_ready(cppn_forward(z_shared, x, y, r, params))
    ref = cppn_reference(jnp.broadcast_to(z_shared, (N, dim_z)), x, y, r, params)
    np.testing.assert_allclose(np.asarray(out), np.asarray(ref), rtol=1e-4, atol=1e-4)
    assert out.shape == (N, dim_c)

    # 2) Per-pixel latent z path, exact f32.
    z_pix = jax.random.normal(kzp, (N, dim_z), jnp.float32)
    out2 = jax.block_until_ready(cppn_forward(z_pix, x, y, r, params))
    ref2 = cppn_reference(z_pix, x, y, r, params)
    np.testing.assert_allclose(np.asarray(out2), np.asarray(ref2), rtol=1e-4, atol=1e-4)

    # 3) bf16 compute path (recommended on v6e/v7x) — looser numerics by design.
    out3 = jax.block_until_ready(
        cppn_forward(z_shared, x, y, r, params, compute_dtype=jnp.bfloat16))
    np.testing.assert_allclose(np.asarray(out3), np.asarray(ref), rtol=0.0, atol=5e-2)

    # 4) VPU rational tanh (recommended on v5e), smaller tile to exercise more steps.
    out4 = jax.block_until_ready(
        cppn_forward(z_shared, x, y, r, params, tile_n=256, tanh_impl="rational"))
    np.testing.assert_allclose(np.asarray(out4), np.asarray(ref), rtol=1e-3, atol=1e-3)

    print("KERNEL_OK")
</pallas_src>

<mosaic_0001>
module attributes {stable_mosaic.version = 11 : i64} {
  func.func @cppn_kernel_shared_z(%arg0: i32, %arg1: memref<1x640xf32, #tpu.memory_space<vmem>>, %arg2: memref<1x640xf32, #tpu.memory_space<vmem>>, %arg3: memref<1x640xf32, #tpu.memory_space<vmem>>, %arg4: memref<32x3xf32, #tpu.memory_space<vmem>>, %arg5: memref<32x1xf32, #tpu.memory_space<vmem>>, %arg6: memref<3x32x32xf32, #tpu.memory_space<vmem>>, %arg7: memref<3x32x1xf32, #tpu.memory_space<vmem>>, %arg8: memref<3x32xf32, #tpu.memory_space<vmem>>, %arg9: memref<3x1xf32, #tpu.memory_space<vmem>>, %arg10: memref<3x640xf32, #tpu.memory_space<vmem>>) attributes {dimension_semantics = [#tpu.dimension_semantics<parallel>], iteration_bounds = array<i64: 2>, scalar_prefetch = 0 : i64, scratch_operands = 0 : i64, tpu.core_type = #tpu.core_type<tc>, window_params = [{transform_indices = @transform_0, window_bounds = array<i64: 1, 640>}, {transform_indices = @transform_1, window_bounds = array<i64: 1, 640>}, {transform_indices = @transform_2, window_bounds = array<i64: 1, 640>}, {pipeline_mode = #tpu.pipeline_mode<synchronous>, transform_indices = @transform_3, window_bounds = array<i64: 32, 3>}, {pipeline_mode = #tpu.pipeline_mode<synchronous>, transform_indices = @transform_4, window_bounds = array<i64: 32, 1>}, {pipeline_mode = #tpu.pipeline_mode<synchronous>, transform_indices = @transform_5, window_bounds = array<i64: 3, 32, 32>}, {pipeline_mode = #tpu.pipeline_mode<synchronous>, transform_indices = @transform_6, window_bounds = array<i64: 3, 32, 1>}, {pipeline_mode = #tpu.pipeline_mode<synchronous>, transform_indices = @transform_7, window_bounds = array<i64: 3, 32>}, {pipeline_mode = #tpu.pipeline_mode<synchronous>, transform_indices = @transform_8, window_bounds = array<i64: 3, 1>}, {transform_indices = @transform_9, window_bounds = array<i64: 3, 640>}]} {
    %c0 = arith.constant 0 : index
    %c0_0 = arith.constant 0 : index
    %0 = vector.load %arg4[%c0, %c0_0] : memref<32x3xf32, #tpu.memory_space<vmem>>, vector<32x1xf32>
    %c0_1 = arith.constant 0 : index
    %c0_2 = arith.constant 0 : index
    %1 = vector.load %arg1[%c0_1, %c0_2] : memref<1x640xf32, #tpu.memory_space<vmem>>, vector<1x640xf32>
    %2 = vector.broadcast %0 : vector<32x1xf32> to vector<32x640xf32>
    %3 = vector.broadcast %1 : vector<1x640xf32> to vector<32x640xf32>
    %4 = arith.mulf %2, %3 : vector<32x640xf32>
    %c0_3 = arith.constant 0 : index
    %c1 = arith.constant 1 : index
    %5 = vector.load %arg4[%c0_3, %c1] : memref<32x3xf32, #tpu.memory_space<vmem>>, vector<32x1xf32>
    %c0_4 = arith.constant 0 : index
    %c0_5 = arith.constant 0 : index
    %6 = vector.load %arg2[%c0_4, %c0_5] : memref<1x640xf32, #tpu.memory_space<vmem>>, vector<1x640xf32>
    %7 = vector.broadcast %5 : vector<32x1xf32> to vector<32x640xf32>
    %8 = vector.broadcast %6 : vector<1x640xf32> to vector<32x640xf32>
    %9 = arith.mulf %7, %8 : vector<32x640xf32>
    %10 = arith.addf %4, %9 : vector<32x640xf32>
    %c0_6 = arith.constant 0 : index
    %c2 = arith.constant 2 : index
    %11 = vector.load %arg4[%c0_6, %c2] : memref<32x3xf32, #tpu.memory_space<vmem>>, vector<32x1xf32>
    %c0_7 = arith.constant 0 : index
    %c0_8 = arith.constant 0 : index
    %12 = vector.load %arg3[%c0_7, %c0_8] : memref<1x640xf32, #tpu.memory_space<vmem>>, vector<1x640xf32>
    %13 = vector.broadcast %11 : vector<32x1xf32> to vector<32x640xf32>
    %14 = vector.broadcast %12 : vector<1x640xf32> to vector<32x640xf32>
    %15 = arith.mulf %13, %14 : vector<32x640xf32>
    %16 = arith.addf %10, %15 : vector<32x640xf32>
    %c0_9 = arith.constant 0 : index
    %c0_10 = arith.constant 0 : index
    %17 = vector.load %arg5[%c0_9, %c0_10] : memref<32x1xf32, #tpu.memory_space<vmem>>, vector<32x1xf32>
    %18 = vector.broadcast %17 : vector<32x1xf32> to vector<32x640xf32>
    %19 = arith.addf %16, %18 : vector<32x640xf32>
    %20 = math.tanh %19 : vector<32x640xf32>
    %c0_11 = arith.constant 0 : index
    %c0_12 = arith.constant 0 : index
    %c0_13 = arith.constant 0 : index
    %21 = vector.load %arg6[%c0_11, %c0_12, %c0_13] : memref<3x32x32xf32, #tpu.memory_space<vmem>>, vector<1x32x32xf32>
    %22 = vector.shape_cast %21 : vector<1x32x32xf32> to vector<32x32xf32>
    %cst = arith.constant dense<0.000000e+00> : vector<32x640xf32>
    %23 = tpu.matmul %22, %20, %cst {dimension_numbers = #tpu.dot_dimension_numbers<[1], [0], [0], [1], [0, 0, 1, 1], [], []>} : vector<32x32xf32>, vector<32x640xf32>, vector<32x640xf32> -> vector<32x640xf32>
    %c0_14 = arith.constant 0 : index
    %c0_15 = arith.constant 0 : index
    %c0_16 = arith.constant 0 : index
    %24 = vector.load %arg7[%c0_14, %c0_15, %c0_16] : memref<3x32x1xf32, #tpu.memory_space<vmem>>, vector<1x32x1xf32>
    %25 = vector.shape_cast %24 : vector<1x32x1xf32> to vector<32x1xf32>
    %26 = vector.broadcast %25 : vector<32x1xf32> to vector<32x640xf32>
    %27 = arith.addf %23, %26 : vector<32x640xf32>
    %28 = math.tanh %27 : vector<32x640xf32>
    %c1_17 = arith.constant 1 : index
    %c0_18 = arith.constant 0 : index
    %c0_19 = arith.constant 0 : index
    %29 = vector.load %arg6[%c1_17, %c0_18, %c0_19] : memref<3x32x32xf32, #tpu.memory_space<vmem>>, vector<1x32x32xf32>
    %30 = vector.shape_cast %29 : vector<1x32x32xf32> to vector<32x32xf32>
    %cst_20 = arith.constant dense<0.000000e+00> : vector<32x640xf32>
    %31 = tpu.matmul %30, %28, %cst_20 {dimension_numbers = #tpu.dot_dimension_numbers<[1], [0], [0], [1], [0, 0, 1, 1], [], []>} : vector<32x32xf32>, vector<32x640xf32>, vector<32x640xf32> -> vector<32x640xf32>
    %c1_21 = arith.constant 1 : index
    %c0_22 = arith.constant 0 : index
    %c0_23 = arith.constant 0 : index
    %32 = vector.load %arg7[%c1_21, %c0_22, %c0_23] : memref<3x32x1xf32, #tpu.memory_space<vmem>>, vector<1x32x1xf32>
    %33 = vector.shape_cast %32 : vector<1x32x1xf32> to vector<32x1xf32>
    %34 = vector.broadcast %33 : vector<32x1xf32> to vector<32x640xf32>
    %35 = arith.addf %31, %34 : vector<32x640xf32>
    %36 = math.tanh %35 : vector<32x640xf32>
    %c2_24 = arith.constant 2 : index
    %c0_25 = arith.constant 0 : index
    %c0_26 = arith.constant 0 : index
    %37 = vector.load %arg6[%c2_24, %c0_25, %c0_26] : memref<3x32x32xf32, #tpu.memory_space<vmem>>, vector<1x32x32xf32>
    %38 = vector.shape_cast %37 : vector<1x32x32xf32> to vector<32x32xf32>
    %cst_27 = arith.constant dense<0.000000e+00> : vector<32x640xf32>
    %39 = tpu.matmul %38, %36, %cst_27 {dimension_numbers = #tpu.dot_dimension_numbers<[1], [0], [0], [1], [0, 0, 1, 1], [], []>} : vector<32x32xf32>, vector<32x640xf32>, vector<32x640xf32> -> vector<32x640xf32>
    %c2_28 = arith.constant 2 : index
    %c0_29 = arith.constant 0 : index
    %c0_30 = arith.constant 0 : index
    %40 = vector.load %arg7[%c2_28, %c0_29, %c0_30] : memref<3x32x1xf32, #tpu.memory_space<vmem>>, vector<1x32x1xf32>
    %41 = vector.shape_cast %40 : vector<1x32x1xf32> to vector<32x1xf32>
    %42 = vector.broadcast %41 : vector<32x1xf32> to vector<32x640xf32>
    %43 = arith.addf %39, %42 : vector<32x640xf32>
    %44 = math.tanh %43 : vector<32x640xf32>
    %c0_31 = arith.constant 0 : index
    %c0_32 = arith.constant 0 : index
    %45 = vector.load %arg8[%c0_31, %c0_32] : memref<3x32xf32, #tpu.memory_space<vmem>>, vector<3x32xf32>
    %cst_33 = arith.constant dense<0.000000e+00> : vector<3x640xf32>
    %46 = tpu.matmul %45, %44, %cst_33 {dimension_numbers = #tpu.dot_dimension_numbers<[1], [0], [0], [1], [0, 0, 1, 1], [], []>} : vector<3x32xf32>, vector<32x640xf32>, vector<3x640xf32> -> vector<3x640xf32>
    %c0_34 = arith.constant 0 : index
    %c0_35 = arith.constant 0 : index
    %47 = vector.load %arg9[%c0_34, %c0_35] : memref<3x1xf32, #tpu.memory_space<vmem>>, vector<3x1xf32>
    %48 = vector.broadcast %47 : vector<3x1xf32> to vector<3x640xf32>
    %49 = arith.addf %46, %48 : vector<3x640xf32>
    %50 = arith.negf %49 : vector<3x640xf32>
    %51 = math.exp %50 : vector<3x640xf32>
    %cst_36 = arith.constant 1.000000e+00 : f32
    %52 = vector.broadcast %cst_36 : f32 to vector<3x640xf32>
    %53 = arith.addf %52, %51 : vector<3x640xf32>
    %54 = arith.divf %52, %53 : vector<3x640xf32>
    %c0_37 = arith.constant 0 : index
    %c0_38 = arith.constant 0 : index
    %55 = vector.load %arg10[%c0_37, %c0_38] : memref<3x640xf32, #tpu.memory_space<vmem>>, vector<3x640xf32>
    tpu.vector_store %arg10[%c0_37, %c0_38], %54 {strides = array<i32>} : memref<3x640xf32, #tpu.memory_space<vmem>>, vector<3x640xf32>,
    return
  }
  func.func @transform_0(%arg0: i32) -> (i32, i32) {
    %c0_i32 = arith.constant 0 : i32
    %c0_i32_0 = arith.constant 0 : i32
    return %c0_i32, %arg0 : i32, i32
  }
  func.func @transform_1(%arg0: i32) -> (i32, i32) {
    %c0_i32 = arith.constant 0 : i32
    %c0_i32_0 = arith.constant 0 : i32
    return %c0_i32, %arg0 : i32, i32
  }
  func.func @transform_2(%arg0: i32) -> (i32, i32) {
    %c0_i32 = arith.constant 0 : i32
    %c0_i32_0 = arith.constant 0 : i32
    return %c0_i32, %arg0 : i32, i32
  }
  func.func @transform_3(%arg0: i32) -> (i32, i32) {
    %c0_i32 = arith.constant 0 : i32
    %c0_i32_0 = arith.constant 0 : i32
    %c0_i32_1 = arith.constant 0 : i32
    return %c0_i32, %c0_i32_0 : i32, i32
  }
  func.func @transform_4(%arg0: i32) -> (i32, i32) {
    %c0_i32 = arith.constant 0 : i32
    %c0_i32_0 = arith.constant 0 : i32
    %c0_i32_1 = arith.constant 0 : i32
    return %c0_i32, %c0_i32_0 : i32, i32
  }
  func.func @transform_5(%arg0: i32) -> (i32, i32, i32) {
    %c0_i32 = arith.constant 0 : i32
    %c0_i32_0 = arith.constant 0 : i32
    %c0_i32_1 = arith.constant 0 : i32
    %c0_i32_2 = arith.constant 0 : i32
    return %c0_i32, %c0_i32_0, %c0_i32_1 : i32, i32, i32
  }
  func.func @transform_6(%arg0: i32) -> (i32, i32, i32) {
    %c0_i32 = arith.constant 0 : i32
    %c0_i32_0 = arith.constant 0 : i32
    %c0_i32_1 = arith.constant 0 : i32
    %c0_i32_2 = arith.constant 0 : i32
    return %c0_i32, %c0_i32_0, %c0_i32_1 : i32, i32, i32
  }
  func.func @transform_7(%arg0: i32) -> (i32, i32) {
    %c0_i32 = arith.constant 0 : i32
    %c0_i32_0 = arith.constant 0 : i32
    %c0_i32_1 = arith.constant 0 : i32
    return %c0_i32, %c0_i32_0 : i32, i32
  }
  func.func @transform_8(%arg0: i32) -> (i32, i32) {
    %c0_i32 = arith.constant 0 : i32
    %c0_i32_0 = arith.constant 0 : i32
    %c0_i32_1 = arith.constant 0 : i32
    return %c0_i32, %c0_i32_0 : i32, i32
  }
  func.func @transform_9(%arg0: i32) -> (i32, i32) {
    %c0_i32 = arith.constant 0 : i32
    %c0_i32_0 = arith.constant 0 : i32
    return %c0_i32, %arg0 : i32, i32
  }
}

</mosaic_0001>

<bundles_post_ra>
// kernel: tpu_custom_call.1
= control target key start
LH: loop header
LB: loop body
LE: loop exit
PB: predicated region body
PF: predicated region fallthrough
CT: control target
= control target key end

     0   :  { %14 = vsyncpa [#allocation3], 0  ;;  %s2977_s0 = inlined_call_operand.vmem [shape: f32[1,1280], index: 0, kind: input, shape index: {}]   ;;  %s2978_s1 = inlined_call_operand.vmem [shape: f32[1,1280], index: 1, kind: input, shape index: {}]   ;;  %s2979_s2 = inlined_call_operand.vmem [shape: f32[1,1280], index: 2, kind: input, shape index: {}]   ;;  %s2980_s3 = inlined_call_operand.vmem [shape: f32[32,3], index: 3, kind: input, shape index: {}]   ;;  %s2981_s4 = inlined_call_operand.vmem [shape: f32[32,1], index: 4, kind: input, shape index: {}]   ;;  %s2982_s5 = inlined_call_operand.vmem [shape: f32[3,32,32], index: 5, kind: input, shape index: {}]   ;;  %s2983_s6 = inlined_call_operand.vmem [shape: f32[3,32,1], index: 6, kind: input, shape index: {}]   ;;  %s2984_s7 = inlined_call_operand.vmem [shape: f32[3,32], index: 7, kind: input, shape index: {}]   ;;  %s2985_s8 = inlined_call_operand.vmem [shape: f32[3,1], index: 8, kind: input, shape index: {}]   ;;  %s2986_s9 = inlined_call_operand.hbm [shape: f32[3,1280], index: 9, kind: output, shape index: {}]  }
   0x1   :  { %16 = vsyncpa [#allocation3 + $0x1], 0  ;;  %s2595_s30 = smov 0   ;;  %s2597_s10 = smov 0  }
   0x2   :  { %s2599_s11 = smov 0   ;;  %s2601_s12 = smov 0  }
   0x3 LB: > { %s2616_s13 = sadd.s32 4294967295, %s2536_s12   ;;  %s1996_s14 = sadd.s32 4294967294, %s2536_s12   ;;  %s2536_s12 = sphi %s2601_s12, %s3005_s12   ;;  %s2532_s11 = sphi %s2599_s11, %s3004_s11   ;;  %s2528_s10 = sphi %s2597_s10, %s3003_s10   ;;  %s2524_s30 = sphi %s2595_s30, %s3002_s30  }
   0x4   : > { %s2620_s15 = sadd.s32 1, %s2536_s12   ;;  %s233_s16 = sadd.s32 1, %s2532_s11 }
   0x5   : > { %s230_s17 = ssub.s32 %s2536_s12, %s2620_s15  ;;  %p243_p0 = scmp.ne.s32.totalorder %s2532_s11, %s2528_s10 }
   0x6   : > { %p231_p1 = scmp.eq.s32.totalorder %s230_s17, 0  ;;  %p244_p2 = scmp.eq.s32.totalorder %s2616_s13, 1 }
   0x7   : > { %p249_p3 = scmp.ne.s32.totalorder %s2528_s10, %s2524_s30  ;;  %p250_p4 = scmp.eq.s32.totalorder %s1996_s14, 1 }
   0x8   : > { %s2631_s18 = scalar_select %p231_p1, %s2532_s11, %s233_s16  }
   0x9   : > { %p2633_p5 = por %p244_p2, %p243_p0  ;;  %p2637_p6 = por %p250_p4, %p249_p3 }
   0xa   : > { %p1999_p7 = scmp.ge.s32.totalorder %s2536_s12, 1  ;;  %p310_p8 = scmp.lt.s32.totalorder %s2536_s12, 3 }
   0xc   : > { %p311_p9 = pnand %p1999_p7, %p310_p8 }
   0xe   : > { %314 = sbr.rel (%p311_p9) target bundleno = 1208 (0x4b8), region = 56 }
  0x15   : > { %v369_v0 = vld [vmem:[%s2980_s3] sm:$0xff]  ;;  %v2538_v1 = vmov 2   ;;  %v2539_v2 = vmov 1   ;;  %v371_v3 = vld [vmem:[%s2980_s3 + $0x10] sm:$0xff]  ;;  %v370_v4 = vld [vmem:[%s2980_s3 + $0x8] sm:$0xff]  ;;  %v2540_v5 = vmov 0   ;;  %v395_v25 = vlaneseq }
  0x16   : > { %2287 = vset.pattern.permute.xlu0 %v2538_v1  ;;  %2286 = vset.pattern.permute.xlu1 %v2539_v2  ;;  %v372_v6 = vld [vmem:[%s2980_s3 + $0x18] sm:$0xff]  ;;  %v607_v7 = vld [vmem:[%s2981_s4 + $0x8] sm:$0xff]  ;;  %v674_v8 = vld [vmem:[%s2983_s6] sm:$0xff]  ;;  %v2987_v24 = vmov 0.0   ;;  %s353_s27 = smul.u32 5, %s2616_s13  ;;  %vm698_vm0 = vcmask 261120  }
  0x17   : > { %525 = vperm.xlu0 %2287, %v369_v0   ;;  %442 = vperm.xlu1 %2286, %v369_v0   ;;  %v676_v9 = vld [vmem:[%s2983_s6 + $0x10] sm:$0xff]  ;;  %v2016_v10 = vld [vmem:[%s2983_s6 + $0x20] sm:$0xff]  ;;  %v609_v15 = vld [vmem:[%s2981_s4 + $0x18] sm:$0xff]  ;;  %v396_v26 = vshrl.u32 %v395_v25, 7  ;;  %vm2543_vm1 = vmmov 0   ;;  %s2063_s29 = smul.u32 320, %s2616_s13 }
  0x18   : > { %v606_v11 = vld [vmem:[%s2981_s4] sm:$0xff]  ;;  %v2018_v12 = vld [vmem:[%s2983_s6 + $0x30] sm:$0xff]  ;;  %v675_v17 = vld [vmem:[%s2983_s6 + $0x8] sm:$0xff]  ;;  %775 = vmatprep.mubr.f32.mxu0 %v2987_v24  ;;  %864 = vmatprep.mubr.f32.mxu1 %v2987_v24  ;;  %p354_p10 = scmp.lt.s32.totalorder %s353_s27, 9  ;;  %s2544_s13 = smov [#allocation2]  }
  0x19   : > { %v608_v13 = vld [vmem:[%s2981_s4 + $0x10] sm:$0xff]  ;;  %v2036_v14 = vld [vmem:[%s2983_s6 + $0x40] sm:$0xff]  ;;  %v677_v19 = vld [vmem:[%s2983_s6 + $0x18] sm:$0xff]  ;;  %v397_v29 = vsub.s32 0, %v396_v26  ;;  %v401_v32 = vsub.s32 1, %v396_v26  ;;  %v405_v33 = vsub.s32 2, %v396_v26  ;;  %s2935_s22 = scalar_lea.hbm %s2986_s9, %s2063_s29 }
  0x1a   : > { %v2038_v16 = vld [vmem:[%s2983_s6 + $0x50] sm:$0xff]  ;;  %v1645_v18 = vld [vmem:[%s2985_s8] sm:$0x7]  ;;  %v2017_v20 = vld [vmem:[%s2983_s6 + $0x28] sm:$0xff]  ;;  %s3007_s27 = smov (!%p354_p10, %s353_s27), 9  ;;  %v409_v34 = vsub.s32 3, %v396_v26 }
  0x1b   : > { %533 = vperm.xlu0 %2287, %v371_v3   ;;  %446 = vperm.xlu1 %2286, %v370_v4   ;;  %v2019_v21 = vld [vmem:[%s2983_s6 + $0x38] sm:$0xff]  ;;  %v2037_v22 = vld [vmem:[%s2983_s6 + $0x48] sm:$0xff]  ;;  %s361_s14 = scalar_lea.vmem %s2978_s1, %s3007_s27  ;;  %s366_s21 = scalar_lea.vmem %s2979_s2, %s3007_s27  ;;  %v413_v35 = vsub.s32 4, %v396_v26 }
  0x1c   : > { %v2039_v23 = vld [vmem:[%s2983_s6 + $0x58] sm:$0xff]  ;;  %v440_v36 = vld [vmem:[%s361_s14] sm:$0x1f]  ;;  %s356_s24 = scalar_lea.vmem %s2977_s0, %s3007_s27  ;;  %s350_s27 = sand.u32 1, %s2528_s10  }
  0x1d   : > { %v523_v37 = vld [vmem:[%s366_s21] sm:$0x1f]  ;;  %v2720_v38 = vrot.slane %v440_v36, %v397_v29  ;;  %v2722_v40 = vrot.slane %v440_v36, %v401_v32  ;;  %v2724_v41 = vrot.slane %v440_v36, %v405_v33  ;;  %v2726_v42 = vrot.slane %v440_v36, %v409_v34  ;;  %s2240_s28 = smul.u32 20, %s350_s27  ;;  %s1908_s23 = scalar_lea.sflag [#allocation3], %s350_s27 }
  0x1e   : > { %v373_v39 = vld [vmem:[%s356_s24] sm:$0x1f]  ;;  %v2728_v43 = vrot.slane %v440_v36, %v413_v35  ;;  %v2730_v46 = vrot.slane %v523_v37, %v397_v29  ;;  %v2732_v47 = vrot.slane %v523_v37, %v401_v32  ;;  %v2734_v48 = vrot.slane %v523_v37, %v405_v33  ;;  %s2478_s25 = sshll.u32 %s2544_s13, 4  ;;  %s2479_s25 = int_to_ptr.vmem [resolvable:$false] %s2478_s25 }
  0x1f   : > { %2291 = vset.pattern.permute.xlu0 %v2540_v5  ;;  %2288 = vset.pattern.permute.xlu1 %v2538_v1  ;;  %v2736_v49 = vrot.slane %v523_v37, %v409_v34  ;;  %v2738_v50 = vrot.slane %v523_v37, %v413_v35  ;;  %v398_v51 = vrot.slane %v373_v39, %v397_v29  ;;  %s352_s14 = scalar_lea.vmem [#allocation2], %s2240_s28  ;;  %s2480_s26 = scalar_lea.vmem %s2479_s25, 640 }
  0x20   : > { %376 = vperm.xlu0 %2291, %v369_v0   ;;  %529 = vperm.xlu1 %2288, %v370_v4   ;;  %2994 = vst [vmem:[#allocation6_spill] sm:$0xff] %v2734_v48  ;;  %v402_v52 = vrot.slane %v373_v39, %v401_v32  ;;  %v406_v54 = vrot.slane %v373_v39, %v405_v33  ;;  %s1922_s16 = sshll.u32 %s352_s14, 4  ;;  %s2937_s16 = int_to_ptr.vmem [resolvable:$true] %s1922_s16 }
  0x21   : > { %v2741_v55 = vrot.slane %v373_v39, %v409_v34  ;;  %v2743_v56 = vrot.slane %v373_v39, %v413_v35  ;;  %s2474_s24 = scalar_lea.vmem %s2937_s16, 320  ;;  %p2481_p0 = scmp.lt.s32.totalorder %s2937_s16, %s2479_s25 }
  0x22   : > { %p2475_p11 = scmp.ne.s32.totalorder %s2937_s16, %s2474_s24  ;;  %p2482_p1 = scmp.lt.s32.totalorder %s2480_s26, %s2474_s24 }
  0x24   : > { %381 = vperm.xlu0 %2291, %v370_v4   ;;  %2289 = vset.pattern.permute.xlu1 %v2540_v5  ;;  %p2476_p12 = pnand %p2475_p11, %p2633_p5  ;;  %p2483_p2 = por %p2482_p1, %p2481_p0 }
  0x25   : > { %386 = vperm.xlu1 %2289, %v371_v3  }
  0x26   : > { %p2477_p13 = pneg %p2476_p12 }
  0x28   : > { %391 = vperm.xlu0 %2291, %v372_v6   ;;  %p2484_p3 = pnand %p2483_p2, %p2477_p13 }
  0x29   : > { %2290 = vset.pattern.permute.xlu1 %v2539_v2 }
  0x2a   : > { %450 = vperm.xlu1 %2290, %v371_v3  }
  0x2c   : > { %617 = vperm.xlu0 %2291, %v607_v7  }
  0x2e   : > { %454 = vperm.xlu1 %2290, %v372_v6  }
  0x30   : > { %680 = vperm.xlu0 %2291, %v674_v8  }
  0x32   : > { %2292 = vset.pattern.permute.xlu1 %v2538_v1 }
  0x33   : > { %537 = vperm.xlu1 %2292, %v372_v6  }
  0x34   : > { %690 = vperm.xlu0 %2291, %v676_v9  }
  0x37   : > { %2293 = vset.pattern.permute.xlu1 %v2540_v5 }
  0x38   : > { %1006 = vperm.xlu0 %2291, %v2016_v10   ;;  %612 = vperm.xlu1 %2293, %v606_v11  }
  0x3c   : > { %1016 = vperm.xlu0 %2291, %v2018_v12   ;;  %622 = vperm.xlu1 %2293, %v608_v13  }
  0x40   : > { %1331 = vperm.xlu0 %2291, %v2036_v14   ;;  %627 = vperm.xlu1 %2293, %v609_v15  }
  0x44   : > { %1341 = vperm.xlu0 %2291, %v2038_v16   ;;  %685 = vperm.xlu1 %2293, %v675_v17  }
  0x48   : > { %1648 = vperm.xlu0 %2291, %v1645_v18   ;;  %695 = vperm.xlu1 %2293, %v677_v19  }
  0x4c   : > { %1011 = vperm.xlu1 %2293, %v2017_v20  }
  0x50   : > { %1021 = vperm.xlu1 %2293, %v2019_v21  }
  0x54   : > { %1336 = vperm.xlu1 %2293, %v2037_v22  }
  0x58   : > { %1346 = vperm.xlu1 %2293, %v2039_v23  }
  0x96   : > { %v443_v27 = vpop.permute.xlu1 %442  ;;  %v526_v28 = vpop.permute.xlu0 %525 }
  0x97   : > { %v483_v53 = vmul.f32 %v2720_v38, %v443_v27  ;;  %v484_v57 = vmul.f32 %v2722_v40, %v443_v27  ;;  %v485_v58 = vmul.f32 %v2724_v41, %v443_v27  ;;  %v486_v59 = vmul.f32 %v2726_v42, %v443_v27 }
  0x98   : > { %v487_v60 = vmul.f32 %v2728_v43, %v443_v27  ;;  %v566_v62 = vmul.f32 %v2730_v46, %v526_v28  ;;  %v2751_v63 = vmul.f32 %v2732_v47, %v526_v28  ;;  %v2754_v0 = vmul.f32 %v2734_v48, %v526_v28 }
  0x99   : > { %v2757_v1 = vmul.f32 %v2736_v49, %v526_v28  ;;  %v2760_v3 = vmul.f32 %v2738_v50, %v526_v28 }
  0x9a   : > { %v447_v30 = vpop.permute.xlu1 %446  ;;  %v2715_v31 = vpop.permute.xlu0 %533 }
  0x9b   : > { %2993 = vst [vmem:[#allocation5_spill] sm:$0xff] %v2715_v31  ;;  %v488_v4 = vmul.f32 %v2720_v38, %v447_v30  ;;  %v489_v5 = vmul.f32 %v2722_v40, %v447_v30  ;;  %v490_v6 = vmul.f32 %v2724_v41, %v447_v30  ;;  %v491_v7 = vmul.f32 %v2726_v42, %v447_v30 }
  0x9c   : > { %v492_v8 = vmul.f32 %v2728_v43, %v447_v30  ;;  %v2769_v9 = vmul.f32 %v2730_v46, %v2715_v31  ;;  %v2775_v15 = vmul.f32 %v2732_v47, %v2715_v31  ;;  %v2779_v16 = vmul.f32 %v2734_v48, %v2715_v31 }
  0x9d   : > { %v2783_v17 = vmul.f32 %v2736_v49, %v2715_v31 }
  0x9e   : > { %2995 = vst [vmem:[#allocation7_spill] sm:$0xff] %v2779_v16 }
  0x9f   : > { %v377_v44 = vpop.permute.xlu0 %376  ;;  %v530_v45 = vpop.permute.xlu1 %529  ;;  %2996 = vst [vmem:[#allocation8_spill] sm:$0xff] %v2783_v17 }
  0xa0   : > { %v420_v10 = vmul.f32 %v398_v51, %v377_v44  ;;  %v421_v11 = vmul.f32 %v402_v52, %v377_v44  ;;  %v422_v12 = vmul.f32 %v406_v54, %v377_v44  ;;  %v423_v13 = vmul.f32 %v2741_v55, %v377_v44 }
  0xa1   : > { %v424_v14 = vmul.f32 %v2743_v56, %v377_v44  ;;  %v571_v19 = vmul.f32 %v2730_v46, %v530_v45  ;;  %v572_v20 = vmul.f32 %v2732_v47, %v530_v45  ;;  %v573_v27 = vmul.f32 %v2734_v48, %v530_v45 }
  0xa2   : > { %v503_v26 = vadd.f32 %v483_v53, %v420_v10  ;;  %v504_v30 = vadd.f32 %v484_v57, %v421_v11  ;;  %v505_v32 = vadd.f32 %v485_v58, %v422_v12  ;;  %v506_v33 = vadd.f32 %v486_v59, %v423_v13 }
  0xa3   : > { %v382_v61 = vpop.permute.xlu0 %381  ;;  %v507_v34 = vadd.f32 %v487_v60, %v424_v14  ;;  %v574_v35 = vmul.f32 %v2736_v49, %v530_v45  ;;  %v575_v36 = vmul.f32 %v2738_v50, %v530_v45 }
  0xa4   : > { %v387_v2 = vpop.permute.xlu1 %386  ;;  %v425_v18 = vmul.f32 %v398_v51, %v382_v61  ;;  %v426_v21 = vmul.f32 %v402_v52, %v382_v61  ;;  %v427_v22 = vmul.f32 %v406_v54, %v382_v61  ;;  %v428_v28 = vmul.f32 %v2741_v55, %v382_v61 }
  0xa5   : > { %v429_v29 = vmul.f32 %v2743_v56, %v382_v61  ;;  %v430_v39 = vmul.f32 %v398_v51, %v387_v2  ;;  %v431_v31 = vmul.f32 %v402_v52, %v387_v2  ;;  %v432_v53 = vmul.f32 %v406_v54, %v387_v2 }
  0xa6   : > { %v508_v37 = vadd.f32 %v488_v4, %v425_v18  ;;  %v509_v44 = vadd.f32 %v489_v5, %v426_v21  ;;  %v510_v24 = vadd.f32 %v490_v6, %v427_v22  ;;  %v511_v17 = vadd.f32 %v491_v7, %v428_v28 }
  0xa7   : > { %v392_v23 = vpop.permute.xlu0 %391  ;;  %v512_v16 = vadd.f32 %v492_v8, %v429_v29  ;;  %v433_v48 = vmul.f32 %v2741_v55, %v387_v2  ;;  %v2794_v57 = vmul.f32 %v2743_v56, %v387_v2  ;;  %v586_v11 = vadd.f32 %v566_v62, %v503_v26 }
  0xa8   : > { %v435_v58 = vmul.f32 %v398_v51, %v392_v23  ;;  %v436_v59 = vmul.f32 %v402_v52, %v392_v23  ;;  %v437_v60 = vmul.f32 %v406_v54, %v392_v23  ;;  %v591_v6 = vadd.f32 %v571_v19, %v508_v37  ;;  %v2997_v37 = vld [vmem:[#allocation6_spill] sm:$0xff] }
  0xa9   : > { %v451_v25 = vpop.permute.xlu1 %450  ;;  %v438_v7 = vmul.f32 %v2741_v55, %v392_v23  ;;  %v2801_v8 = vmul.f32 %v2743_v56, %v392_v23  ;;  %v592_v12 = vadd.f32 %v572_v20, %v509_v44  ;;  %v593_v52 = vadd.f32 %v573_v27, %v510_v24  ;;  %v2998_v44 = vld [vmem:[#allocation7_spill] sm:$0xff] }
  0xaa   : > { %v493_v45 = vmul.f32 %v2720_v38, %v451_v25  ;;  %v494_v4 = vmul.f32 %v2722_v40, %v451_v25  ;;  %v495_v5 = vmul.f32 %v2724_v41, %v451_v25  ;;  %v496_v2 = vmul.f32 %v2726_v42, %v451_v25 }
  0xab   : > { %v618_v61 = vpop.permute.xlu0 %617  ;;  %v497_v51 = vmul.f32 %v2728_v43, %v451_v25  ;;  %v594_v54 = vadd.f32 %v574_v35, %v511_v17  ;;  %v595_v14 = vadd.f32 %v575_v36, %v512_v16  ;;  %v587_v19 = vadd.f32 %v2751_v63, %v504_v30 }
  0xac   : > { %v635_v62 = vadd.f32 %v618_v61, %v591_v6  ;;  %v636_v18 = vadd.f32 %v618_v61, %v592_v12  ;;  %v513_v22 = vadd.f32 %v493_v45, %v430_v39  ;;  %v514_v55 = vadd.f32 %v494_v4, %v431_v31 }
  0xad   : > { %v455_v10 = vpop.permute.xlu1 %454  ;;  %v515_v26 = vadd.f32 %v495_v5, %v432_v53  ;;  %v637_v56 = vadd.f32 %v618_v61, %v593_v52  ;;  %v516_v23 = vadd.f32 %v496_v2, %v433_v48  ;;  %v638_v28 = vadd.f32 %v618_v61, %v594_v54 }
  0xae   : > { %v498_v21 = vmul.f32 %v2720_v38, %v455_v10  ;;  %v639_v29 = vadd.f32 %v618_v61, %v595_v14  ;;  %v499_v20 = vmul.f32 %v2722_v40, %v455_v10  ;;  %2294 = vtanh.f32 %v635_v62 }
  0xaf   : > { %v500_v24 = vmul.f32 %v2724_v41, %v455_v10  ;;  %v501_v17 = vmul.f32 %v2726_v42, %v455_v10  ;;  %v588_v16 = vadd.f32 %v2754_v0, %v505_v32  ;;  %2296 = vtanh.f32 %v636_v18 }
  0xb0   : > { %v502_v38 = vmul.f32 %v2728_v43, %v455_v10  ;;  %v518_v63 = vadd.f32 %v498_v21, %v435_v58  ;;  %v589_v31 = vadd.f32 %v2757_v1, %v506_v33  ;;  %2298 = vtanh.f32 %v637_v56 }
  0xb1   : > { %2300 = vtanh.f32 %v638_v28  ;;  %v519_v40 = vadd.f32 %v499_v20, %v436_v59  ;;  %v590_v35 = vadd.f32 %v2760_v3, %v507_v34  ;;  %v520_v36 = vadd.f32 %v500_v24, %v437_v60 }
  0xb2   : > { %v538_v13 = vpop.permute.xlu1 %537  ;;  %v596_v0 = vadd.f32 %v2769_v9, %v513_v22  ;;  %v597_v33 = vadd.f32 %v2775_v15, %v514_v55  ;;  %v598_v53 = vadd.f32 %v2998_v44, %v515_v26  ;;  %v521_v9 = vadd.f32 %v501_v17, %v438_v7 }
  0xb3   : > { %v581_v42 = vmul.f32 %v2730_v46, %v538_v13  ;;  %v582_v43 = vmul.f32 %v2732_v47, %v538_v13  ;;  %v583_v39 = vmul.f32 %v2997_v37, %v538_v13  ;;  %v584_v34 = vmul.f32 %v2736_v49, %v538_v13  ;;  %v2999_v46 = vld [vmem:[#allocation8_spill] sm:$0xff]  ;;  %v673_v37 = vld [vmem:[%s2982_s5 + $0x18] sm:$0xff] }
  0xb4   : > { %v599_v10 = vadd.f32 %v2999_v46, %v516_v23  ;;  %v585_v60 = vmul.f32 %v2738_v50, %v538_v13  ;;  %v517_v4 = vadd.f32 %v497_v51, %v2794_v57  ;;  %v522_v2 = vadd.f32 %v502_v38, %v2801_v8  ;;  %v3000_v13 = vld [vmem:[#allocation5_spill] sm:$0xff] }
  0xb5   : > { %v601_v59 = vadd.f32 %v581_v42, %v518_v63  ;;  %v603_v5 = vadd.f32 %v583_v39, %v520_v36  ;;  %v604_v12 = vadd.f32 %v584_v34, %v521_v9  ;;  %v580_v14 = vmul.f32 %v2738_v50, %v3000_v13  ;;  %v670_v42 = vld [vmem:[%s2982_s5] sm:$0xff]  ;;  %v681_v39 = vpop.permute.xlu0 %680 }
  0xb6   : > { %v605_v18 = vadd.f32 %v585_v60, %v522_v2 }
  0xb7   : > { %v613_v25 = vpop.permute.xlu1 %612 }
  0xb8   : > { %v630_v48 = vadd.f32 %v613_v25, %v586_v11  ;;  %v631_v27 = vadd.f32 %v613_v25, %v587_v19  ;;  %v632_v30 = vadd.f32 %v613_v25, %v588_v16  ;;  %v633_v41 = vadd.f32 %v613_v25, %v589_v31  ;;  %v2295_v45 = vpop.eup %2294 }
  0xb9   : > { %v634_v32 = vadd.f32 %v613_v25, %v590_v35  ;;  %v602_v11 = vadd.f32 %v582_v43, %v519_v40  ;;  %v2297_v6 = vpop.eup %2296  ;;  %v600_v19 = vadd.f32 %v580_v14, %v517_v4 }
  0xba   : > { %2302 = vtanh.f32 %v630_v48  ;;  %v2299_v52 = vpop.eup %2298 }
  0xbb   : > { %2304 = vtanh.f32 %v631_v27  ;;  %v623_v1 = vpop.permute.xlu1 %622  ;;  %v2301_v62 = vpop.eup %2300 }
  0xbc   : > { %2306 = vtanh.f32 %v632_v30  ;;  %v640_v3 = vadd.f32 %v623_v1, %v596_v0  ;;  %v641_v58 = vadd.f32 %v623_v1, %v597_v33  ;;  %v642_v47 = vadd.f32 %v623_v1, %v598_v53  ;;  %v672_v33 = vld [vmem:[%s2982_s5 + $0x10] sm:$0xff] }
  0xbd   : > { %2308 = vtanh.f32 %v633_v41  ;;  %v643_v15 = vadd.f32 %v623_v1, %v599_v10  ;;  %v644_v23 = vadd.f32 %v623_v1, %v600_v19  ;;  %v671_v1 = vld [vmem:[%s2982_s5 + $0x8] sm:$0xff] }
  0xbe   : > { %2310 = vtanh.f32 %v639_v29 }
  0xbf   : > { %2312 = vtanh.f32 %v634_v32  ;;  %v628_v61 = vpop.permute.xlu1 %627  ;;  %v3001_v32 = vmov 0.0  }
  0xc0   : > { %2314 = vtanh.f32 %v640_v3  ;;  %v645_v49 = vadd.f32 %v628_v61, %v601_v59  ;;  %v646_v7 = vadd.f32 %v628_v61, %v602_v11  ;;  %v647_v54 = vadd.f32 %v628_v61, %v603_v5  ;;  %v691_v5 = vpop.permute.xlu0 %690 }
  0xc1   : > { %2316 = vtanh.f32 %v641_v58  ;;  %v648_v21 = vadd.f32 %v628_v61, %v604_v12  ;;  %v649_v22 = vadd.f32 %v628_v61, %v605_v18 }
  0xc2   : > { %2318 = vtanh.f32 %v642_v47 }
  0xc3   : > { %2320 = vtanh.f32 %v643_v15  ;;  %v686_v9 = vpop.permute.xlu1 %685 }
  0xc4   : > { %v2303_v57 = vpop.eup %2302  ;;  %2322 = vtanh.f32 %v645_v49 }
  0xc5   : > { %v2305_v51 = vpop.eup %2304  ;;  %2324 = vtanh.f32 %v646_v7  ;;  %v2148_v8 = vpack.c.bf16 %v2295_v45, %v2303_v57 }
  0xc6   : > { %v2307_v55 = vpop.eup %2306  ;;  %2326 = vtanh.f32 %v647_v54  ;;  %v2146_v26 = vpack.c.bf16 %v2297_v6, %v2305_v51 }
  0xc7   : > { %v2309_v56 = vpop.eup %2308  ;;  %2328 = vtanh.f32 %v648_v21  ;;  %v2156_v28 = vpack.c.bf16 %v2299_v52, %v2307_v55  ;;  %v696_v13 = vpop.permute.xlu1 %695 }
  0xc8   : > { %v2311_v29 = vpop.eup %2310  ;;  %2147 = vmatprep.subr.bf16.mxu0 %v2146_v26  ;;  %v2154_v50 = vpack.c.bf16 %v2301_v62, %v2309_v56  ;;  %2330 = vtanh.f32 %v649_v22 }
  0xc9   : > { %v2313_v20 = vpop.eup %2312  ;;  %2149 = vmatpush1.bf16.msra.mxu0 %v2148_v8  ;;  %2332 = vtanh.f32 %v644_v23 }
  0xca   : > { %v2315_v24 = vpop.eup %2314  ;;  %2155 = vmatprep.subr.bf16.mxu1 %v2154_v50  ;;  %v2162_v41 = vpack.c.bf16 %v2311_v29, %v2313_v20 }
  0xcb   : > { %v2317_v17 = vpop.eup %2316  ;;  %2157 = vmatpush1.bf16.msra.mxu1 %v2156_v28 }
  0xcc   : > { %v2319_v16 = vpop.eup %2318 }
  0xcd   : > { %v2321_v38 = vpop.eup %2320 }
  0xce   : > { %v2323_v63 = vpop.eup %2322 }
  0xcf   : > { %v2325_v25 = vpop.eup %2324  ;;  %v2152_v31 = vpack.c.bf16 %v2323_v63, %v2315_v24 }
  0xd0   : > { %v2327_v48 = vpop.eup %2326  ;;  %v2150_v27 = vpack.c.bf16 %v2325_v25, %v2317_v17 }
  0xd1   : > { %v2329_v30 = vpop.eup %2328  ;;  %v2160_v40 = vpack.c.bf16 %v2327_v48, %v2319_v16 }
  0xd2   : > { %2151 = vmatprep.subr.bf16.mxu0 %v2150_v27  ;;  %v2158_v35 = vpack.c.bf16 %v2329_v30, %v2321_v38  ;;  %v2331_v36 = vpop.eup %2330 }
  0xd3   : > { %2153 = vmatpush1.bf16.msra.mxu0 %v2152_v31  ;;  %v2333_v0 = vpop.eup %2332 }
  0xd4   : > { %2159 = vmatprep.subr.bf16.mxu1 %v2158_v35  ;;  %2163 = vmatprep.subr.bf16.mxu0 %v2162_v41  ;;  %v2166_v43 = vpack.c.bf16 %v2331_v36, %v2333_v0 }
  0xd5   : > { %2161 = vmatpush1.bf16.msra.mxu1 %v2160_v40 }
  0xd6   : > { %2000 = vmatmul.mubr.msk.f32.vlgmr.msra.gmra.mrb[0].mxu0 %vm698_vm0, %v670_v42 }
  0xd7   : > { %2165 = vmatpush3.bf16.msra.mxu0 %v2162_v41  ;;  %781 = vmatprep.mubr.f32.mxu0 %v3001_v32 }
  0xd8   : > { %2004 = vmatmul.mubr.msk.f32.vlgmr.msra.gmra.mrb[0].mxu1 %vm698_vm0, %v670_v42  ;;  %2167 = vmatprep.subr.bf16.mxu0 %v2166_v43 }
  0xd9   : > { %870 = vmatprep.mubr.f32.mxu1 %v3001_v32 }
  0xda   : > { %2001 = vmatmul.mubr.msk.f32.gmra.mrb[2].mxu0 %vm698_vm0, %v671_v1 }
  0xdb   : > { %2169 = vmatpush3.bf16.msra.mxu0 %v2166_v43  ;;  %787 = vmatprep.mubr.f32.mxu0 %v3001_v32 }
  0xdc   : > { %2005 = vmatmul.mubr.msk.f32.gmra.mrb[2].mxu1 %vm698_vm0, %v671_v1 }
  0xdd   : > { %876 = vmatprep.mubr.f32.mxu1 %v3001_v32 }
  0xde   : > { %2002 = vmatmul.mubr.msk.f32.gmra.mrb[4].mxu0 %vm698_vm0, %v672_v33 }
  0xdf   : > { %793 = vmatprep.mubr.f32.mxu0 %v3001_v32 }
  0xe0   : > { %2006 = vmatmul.mubr.msk.f32.gmra.mrb[4].mxu1 %vm698_vm0, %v672_v33 }
  0xe1   : > { %882 = vmatprep.mubr.f32.mxu1 %v3001_v32 }
  0xe2   : > { %2003 = vmatmul.mubr.msk.f32.gmra.mrb[6].mxu0 %vm698_vm0, %v673_v37 }
  0xe3   : > { %2101 = vmatprep.mubr.msk.f32.mxu0 %vm698_vm0, %v670_v42 }
  0xe4   : > { %2007 = vmatmul.mubr.msk.f32.gmra.mrb[6].mxu1 %vm698_vm0, %v673_v37 }
  0xe5   : > { %1100 = vmatprep.mubr.f32.mxu1 %v3001_v32 }
  0xe6   : > { %2102 = vmatmul.mubr.msk.f32.vlgmr.msra.gmra.mrb[8].mxu0 %vm698_vm0, %v671_v1 }
  0xe7   : > { %2104 = vmatprep.mubr.msk.f32.mxu0 %vm698_vm0, %v672_v33 }
  0xea   : > { %2105 = vmatmul.mubr.msk.f32.gmra.mrb[10].mxu0 %vm698_vm0, %v673_v37 }
  0xeb   : > { %1189 = vmatprep.mubr.f32.mxu0 %v3001_v32 }
 0x1a9   : > { %v777_v44 = vpop.f32.mrb[0].mxu0 }
 0x1aa   : > { %v778_v53 = vadd.f32 %v777_v44, %v681_v39  ;;  %v779_v3 = vpop.f32.mrb[1].mxu0 }
 0x1ab   : > { %v866_v34 = vpop.f32.mrb[0].mxu1  ;;  %v780_v46 = vadd.f32 %v779_v3, %v681_v39 }
 0x1ac   : > { %2334 = vtanh.f32 %v778_v53  ;;  %v867_v10 = vadd.f32 %v866_v34, %v681_v39  ;;  %v868_v58 = vpop.f32.mrb[1].mxu1 }
 0x1ad   : > { %2336 = vtanh.f32 %v780_v46  ;;  %v869_v47 = vadd.f32 %v868_v58, %v681_v39  ;;  %v783_v59 = vpop.f32.mrb[2].mxu0  ;;  %v2012_v58 = vld [vmem:[%s2982_s5 + $0x20] sm:$0xff] }
 0x1ae   : > { %2338 = vtanh.f32 %v867_v10  ;;  %v784_v60 = vadd.f32 %v783_v59, %v686_v9  ;;  %v785_v15 = vpop.f32.mrb[3].mxu0 }
 0x1af   : > { %2340 = vtanh.f32 %v869_v47  ;;  %v872_v61 = vpop.f32.mrb[2].mxu1  ;;  %v786_v11 = vadd.f32 %v785_v15, %v686_v9 }
 0x1b0   : > { %2342 = vtanh.f32 %v784_v60  ;;  %v873_v45 = vadd.f32 %v872_v61, %v686_v9  ;;  %v874_v4 = vpop.f32.mrb[3].mxu1  ;;  %v2013_v60 = vld [vmem:[%s2982_s5 + $0x28] sm:$0xff]  ;;  %v2014_v61 = vld [vmem:[%s2982_s5 + $0x30] sm:$0xff] }
 0x1b1   : > { %2344 = vtanh.f32 %v786_v11  ;;  %v875_v49 = vadd.f32 %v874_v4, %v686_v9  ;;  %v789_v6 = vpop.f32.mrb[4].mxu0  ;;  %v2015_v11 = vld [vmem:[%s2982_s5 + $0x38] sm:$0xff] }
 0x1b2   : > { %2346 = vtanh.f32 %v873_v45  ;;  %v790_v2 = vadd.f32 %v789_v6, %v691_v5  ;;  %v791_v12 = vpop.f32.mrb[5].mxu0  ;;  %v1007_v45 = vpop.permute.xlu0 %1006 }
 0x1b3   : > { %2348 = vtanh.f32 %v875_v49  ;;  %v878_v7 = vpop.f32.mrb[4].mxu1  ;;  %v792_v52 = vadd.f32 %v791_v12, %v691_v5 }
 0x1b4   : > { %2350 = vtanh.f32 %v790_v2  ;;  %v879_v54 = vadd.f32 %v878_v7, %v691_v5  ;;  %v880_v62 = vpop.f32.mrb[5].mxu1 }
 0x1b5   : > { %2352 = vtanh.f32 %v792_v52  ;;  %v881_v14 = vadd.f32 %v880_v62, %v691_v5  ;;  %v795_v18 = vpop.f32.mrb[6].mxu0  ;;  %v1012_v52 = vpop.permute.xlu1 %1011 }
 0x1b6   : > { %v2335_v21 = vpop.eup %2334  ;;  %2354 = vtanh.f32 %v879_v54  ;;  %v796_v57 = vadd.f32 %v795_v18, %v696_v13  ;;  %v797_v51 = vpop.f32.mrb[7].mxu0 }
 0x1b7   : > { %v2337_v19 = vpop.eup %2336  ;;  %2356 = vtanh.f32 %v881_v14  ;;  %v884_v22 = vpop.f32.mrb[6].mxu1  ;;  %v798_v8 = vadd.f32 %v797_v51, %v696_v13 }
 0x1b8   : > { %v2339_v55 = vpop.eup %2338  ;;  %2358 = vtanh.f32 %v796_v57  ;;  %v885_v26 = vadd.f32 %v884_v22, %v696_v13  ;;  %v886_v56 = vpop.f32.mrb[7].mxu1 }
 0x1b9   : > { %v2341_v23 = vpop.eup %2340  ;;  %2360 = vtanh.f32 %v798_v8  ;;  %v887_v28 = vadd.f32 %v886_v56, %v696_v13  ;;  %v2103_v29 = vpop.f32.mrb[8].mxu0 }
 0x1ba   : > { %v2343_v50 = vpop.eup %2342  ;;  %2362 = vtanh.f32 %v885_v26  ;;  %v961_v20 = vadd.f32 %v2103_v29, %v686_v9  ;;  %v955_v24 = vpop.f32.mrb[9].mxu0 }
 0x1bb   : > { %v2345_v17 = vpop.eup %2344  ;;  %2364 = vtanh.f32 %v887_v28  ;;  %v956_v16 = vadd.f32 %v955_v24, %v681_v39  ;;  %v2172_v38 = vpack.c.bf16 %v2343_v50, %v2335_v21  ;;  %v1022_v50 = vpop.permute.xlu1 %1021 }
 0x1bc   : > { %v2347_v63 = vpop.eup %2346  ;;  %2366 = vtanh.f32 %v961_v20  ;;  %v2170_v25 = vpack.c.bf16 %v2345_v17, %v2337_v19  ;;  %v1017_v19 = vpop.permute.xlu0 %1016 }
 0x1bd   : > { %v2349_v31 = vpop.eup %2348  ;;  %2368 = vtanh.f32 %v956_v16  ;;  %v2106_v48 = vpop.f32.mrb[10].mxu0  ;;  %v2180_v27 = vpack.c.bf16 %v2347_v63, %v2339_v55 }
 0x1be   : > { %v2351_v30 = vpop.eup %2350  ;;  %v971_v40 = vadd.f32 %v2106_v48, %v696_v13  ;;  %v965_v35 = vpop.f32.mrb[11].mxu0  ;;  %2171 = vmatprep.subr.bf16.mxu1 %v2170_v25  ;;  %v2178_v41 = vpack.c.bf16 %v2349_v31, %v2341_v23 }
 0x1bf   : > { %v2353_v36 = vpop.eup %2352  ;;  %v966_v42 = vadd.f32 %v965_v35, %v691_v5  ;;  %2173 = vmatpush1.bf16.msra.mxu1 %v2172_v38 }
 0x1c0   : > { %v2355_v0 = vpop.eup %2354  ;;  %2370 = vtanh.f32 %v971_v40  ;;  %2179 = vmatprep.subr.bf16.mxu0 %v2178_v41 }
 0x1c1   : > { %v2357_v43 = vpop.eup %2356  ;;  %2372 = vtanh.f32 %v966_v42  ;;  %2181 = vmatpush1.bf16.msra.mxu0 %v2180_v27 }
 0x1c2   : > { %v2359_v1 = vpop.eup %2358 }
 0x1c3   : > { %v2361_v33 = vpop.eup %2360  ;;  %v2176_v37 = vpack.c.bf16 %v2359_v1, %v2351_v30 }
 0x1c4   : > { %v2363_v39 = vpop.eup %2362  ;;  %v2174_v44 = vpack.c.bf16 %v2361_v33, %v2353_v36 }
 0x1c5   : > { %v2365_v53 = vpop.eup %2364  ;;  %v2184_v3 = vpack.c.bf16 %v2363_v39, %v2355_v0 }
 0x1c6   : > { %v2367_v34 = vpop.eup %2366  ;;  %2175 = vmatprep.subr.bf16.mxu1 %v2174_v44  ;;  %v2182_v46 = vpack.c.bf16 %v2365_v53, %v2357_v43 }
 0x1c7   : > { %v2369_v10 = vpop.eup %2368  ;;  %2177 = vmatpush1.bf16.msra.mxu1 %v2176_v37 }
 0x1c8   : > { %2183 = vmatprep.subr.bf16.mxu0 %v2182_v46  ;;  %v2186_v9 = vpack.c.bf16 %v2367_v34, %v2369_v10 }
 0x1c9   : > { %2185 = vmatpush1.bf16.msra.mxu0 %v2184_v3 }
 0x1ca   : > { %v2371_v47 = vpop.eup %2370  ;;  %2020 = vmatmul.mubr.msk.f32.vlgmr.msra.gmra.mrb[8].mxu1 %vm698_vm0, %v2012_v58  ;;  %2187 = vmatprep.subr.bf16.mxu1 %v2186_v9 }
 0x1cb   : > { %v2373_v59 = vpop.eup %2372  ;;  %2189 = vmatpush3.bf16.msra.mxu1 %v2186_v9  ;;  %1106 = vmatprep.mubr.f32.mxu1 %v3001_v32 }
 0x1cc   : > { %2024 = vmatmul.mubr.msk.f32.vlgmr.msra.gmra.mrb[12].mxu0 %vm698_vm0, %v2012_v58  ;;  %v2190_v15 = vpack.c.bf16 %v2371_v47, %v2373_v59 }
 0x1cd   : > { %1195 = vmatprep.mubr.f32.mxu0 %v3001_v32 }
 0x1ce   : > { %2021 = vmatmul.mubr.msk.f32.gmra.mrb[10].mxu1 %vm698_vm0, %v2013_v60  ;;  %2191 = vmatprep.subr.bf16.mxu1 %v2190_v15 }
 0x1cf   : > { %2193 = vmatpush3.bf16.msra.mxu1 %v2190_v15  ;;  %1112 = vmatprep.mubr.f32.mxu1 %v3001_v32 }
 0x1d0   : > { %2025 = vmatmul.mubr.msk.f32.gmra.mrb[14].mxu0 %vm698_vm0, %v2013_v60 }
 0x1d1   : > { %1201 = vmatprep.mubr.f32.mxu0 %v3001_v32 }
 0x1d2   : > { %2022 = vmatmul.mubr.msk.f32.gmra.mrb[12].mxu1 %vm698_vm0, %v2014_v61 }
 0x1d3   : > { %1118 = vmatprep.mubr.f32.mxu1 %v3001_v32 }
 0x1d4   : > { %2026 = vmatmul.mubr.msk.f32.gmra.mrb[16].mxu0 %vm698_vm0, %v2014_v61 }
 0x1d5   : > { %1207 = vmatprep.mubr.f32.mxu0 %v3001_v32 }
 0x1d6   : > { %2023 = vmatmul.mubr.msk.f32.gmra.mrb[14].mxu1 %vm698_vm0, %v2015_v11 }
 0x1d7   : > { %2115 = vmatprep.mubr.msk.f32.mxu1 %vm698_vm0, %v2012_v58 }
 0x1d8   : > { %2027 = vmatmul.mubr.msk.f32.gmra.mrb[18].mxu0 %vm698_vm0, %v2015_v11 }
 0x1d9   : > { %1425 = vmatprep.mubr.f32.mxu0 %v3001_v32 }
 0x1da   : > { %2116 = vmatmul.mubr.msk.f32.vlgmr.msra.gmra.mrb[16].mxu1 %vm698_vm0, %v2013_v60 }
 0x1db   : > { %2118 = vmatprep.mubr.msk.f32.mxu1 %vm698_vm0, %v2014_v61 }
 0x1de   : > { %2119 = vmatmul.mubr.msk.f32.gmra.mrb[18].mxu1 %vm698_vm0, %v2015_v11 }
 0x1df   : > { %1514 = vmatprep.mubr.f32.mxu1 %v3001_v32 }
 0x29d   : > { %v1102_v4 = vpop.f32.mrb[8].mxu1 }
 0x29e   : > { %v1103_v5 = vadd.f32 %v1102_v4, %v1007_v45  ;;  %v1104_v49 = vpop.f32.mrb[9].mxu1 }
 0x29f   : > { %v1191_v6 = vpop.f32.mrb[12].mxu0  ;;  %v1105_v2 = vadd.f32 %v1104_v49, %v1007_v45 }
 0x2a0   : > { %2374 = vtanh.f32 %v1103_v5  ;;  %v1192_v12 = vadd.f32 %v1191_v6, %v1007_v45  ;;  %v1193_v7 = vpop.f32.mrb[13].mxu0 }
 0x2a1   : > { %2376 = vtanh.f32 %v1105_v2  ;;  %v1194_v54 = vadd.f32 %v1193_v7, %v1007_v45  ;;  %v1108_v62 = vpop.f32.mrb[10].mxu1  ;;  %v2032_v7 = vld [vmem:[%s2982_s5 + $0x40] sm:$0xff] }
 0x2a2   : > { %2378 = vtanh.f32 %v1192_v12  ;;  %v1109_v13 = vadd.f32 %v1108_v62, %v1012_v52  ;;  %v1110_v14 = vpop.f32.mrb[11].mxu1 }
 0x2a3   : > { %2380 = vtanh.f32 %v1194_v54  ;;  %v1197_v18 = vpop.f32.mrb[14].mxu0  ;;  %v1111_v21 = vadd.f32 %v1110_v14, %v1012_v52 }
 0x2a4   : > { %2382 = vtanh.f32 %v1109_v13  ;;  %v1198_v57 = vadd.f32 %v1197_v18, %v1012_v52  ;;  %v1199_v51 = vpop.f32.mrb[15].mxu0  ;;  %v2033_v13 = vld [vmem:[%s2982_s5 + $0x48] sm:$0xff]  ;;  %v2034_v18 = vld [vmem:[%s2982_s5 + $0x50] sm:$0xff] }
 0x2a5   : > { %2384 = vtanh.f32 %v1111_v21  ;;  %v1200_v22 = vadd.f32 %v1199_v51, %v1012_v52  ;;  %v1114_v8 = vpop.f32.mrb[12].mxu1  ;;  %v2035_v21 = vld [vmem:[%s2982_s5 + $0x58] sm:$0xff] }
 0x2a6   : > { %2386 = vtanh.f32 %v1198_v57  ;;  %v1115_v55 = vadd.f32 %v1114_v8, %v1017_v19  ;;  %v1116_v26 = vpop.f32.mrb[13].mxu1  ;;  %v1332_v57 = vpop.permute.xlu0 %1331 }
 0x2a7   : > { %2388 = vtanh.f32 %v1200_v22  ;;  %v1203_v56 = vpop.f32.mrb[16].mxu0  ;;  %v1117_v23 = vadd.f32 %v1116_v26, %v1017_v19 }
 0x2a8   : > { %2390 = vtanh.f32 %v1115_v55  ;;  %v1204_v28 = vadd.f32 %v1203_v56, %v1017_v19  ;;  %v1205_v29 = vpop.f32.mrb[17].mxu0 }
 0x2a9   : > { %2392 = vtanh.f32 %v1117_v23  ;;  %v1206_v20 = vadd.f32 %v1205_v29, %v1017_v19  ;;  %v1120_v24 = vpop.f32.mrb[14].mxu1  ;;  %v1337_v23 = vpop.permute.xlu1 %1336 }
 0x2aa   : > { %v2375_v17 = vpop.eup %2374  ;;  %2394 = vtanh.f32 %v1204_v28  ;;  %v1121_v16 = vadd.f32 %v1120_v24, %v1022_v50  ;;  %v1122_v38 = vpop.f32.mrb[15].mxu1 }
 0x2ab   : > { %v2377_v63 = vpop.eup %2376  ;;  %2396 = vtanh.f32 %v1206_v20  ;;  %v1209_v25 = vpop.f32.mrb[18].mxu0  ;;  %v1123_v31 = vadd.f32 %v1122_v38, %v1022_v50 }
 0x2ac   : > { %v2379_v48 = vpop.eup %2378  ;;  %2398 = vtanh.f32 %v1121_v16  ;;  %v1210_v27 = vadd.f32 %v1209_v25, %v1022_v50  ;;  %v1211_v30 = vpop.f32.mrb[19].mxu0 }
 0x2ad   : > { %v2381_v40 = vpop.eup %2380  ;;  %2400 = vtanh.f32 %v1123_v31  ;;  %v1212_v35 = vadd.f32 %v1211_v30, %v1022_v50  ;;  %v2117_v41 = vpop.f32.mrb[16].mxu1 }
 0x2ae   : > { %v2383_v36 = vpop.eup %2382  ;;  %2402 = vtanh.f32 %v1210_v27  ;;  %v1286_v42 = vadd.f32 %v2117_v41, %v1012_v52  ;;  %v1280_v0 = vpop.f32.mrb[17].mxu1 }
 0x2af   : > { %v2385_v43 = vpop.eup %2384  ;;  %2404 = vtanh.f32 %v1212_v35  ;;  %v1281_v1 = vadd.f32 %v1280_v0, %v1007_v45  ;;  %v2196_v33 = vpack.c.bf16 %v2383_v36, %v2375_v17  ;;  %v1347_v36 = vpop.permute.xlu1 %1346 }
 0x2b0   : > { %v2387_v37 = vpop.eup %2386  ;;  %2406 = vtanh.f32 %v1286_v42  ;;  %v2194_v39 = vpack.c.bf16 %v2385_v43, %v2377_v63  ;;  %v1342_v63 = vpop.permute.xlu0 %1341 }
 0x2b1   : > { %v2389_v44 = vpop.eup %2388  ;;  %2408 = vtanh.f32 %v1281_v1  ;;  %v2120_v53 = vpop.f32.mrb[18].mxu1  ;;  %v2204_v3 = vpack.c.bf16 %v2387_v37, %v2379_v48 }
 0x2b2   : > { %v2391_v34 = vpop.eup %2390  ;;  %v1296_v46 = vadd.f32 %v2120_v53, %v1022_v50  ;;  %v1290_v10 = vpop.f32.mrb[19].mxu1  ;;  %2195 = vmatprep.subr.bf16.mxu0 %v2194_v39  ;;  %v2202_v58 = vpack.c.bf16 %v2389_v44, %v2381_v40 }
 0x2b3   : > { %v2393_v9 = vpop.eup %2392  ;;  %v1291_v47 = vadd.f32 %v1290_v10, %v1017_v19  ;;  %2197 = vmatpush1.bf16.msra.mxu0 %v2196_v33 }
 0x2b4   : > { %v2395_v59 = vpop.eup %2394  ;;  %2410 = vtanh.f32 %v1296_v46  ;;  %2203 = vmatprep.subr.bf16.mxu1 %v2202_v58 }
 0x2b5   : > { %v2397_v60 = vpop.eup %2396  ;;  %2412 = vtanh.f32 %v1291_v47  ;;  %2205 = vmatpush1.bf16.msra.mxu1 %v2204_v3 }
 0x2b6   : > { %v2399_v15 = vpop.eup %2398 }
 0x2b7   : > { %v2401_v61 = vpop.eup %2400  ;;  %v2200_v11 = vpack.c.bf16 %v2399_v15, %v2391_v34 }
 0x2b8   : > { %v2403_v45 = vpop.eup %2402  ;;  %v2198_v4 = vpack.c.bf16 %v2401_v61, %v2393_v9 }
 0x2b9   : > { %v2405_v5 = vpop.eup %2404  ;;  %v2208_v49 = vpack.c.bf16 %v2403_v45, %v2395_v59 }
 0x2ba   : > { %v2407_v6 = vpop.eup %2406  ;;  %2199 = vmatprep.subr.bf16.mxu0 %v2198_v4  ;;  %v2206_v2 = vpack.c.bf16 %v2405_v5, %v2397_v60 }
 0x2bb   : > { %v2409_v12 = vpop.eup %2408  ;;  %2201 = vmatpush1.bf16.msra.mxu0 %v2200_v11 }
 0x2bc   : > { %2207 = vmatprep.subr.bf16.mxu1 %v2206_v2  ;;  %v2210_v52 = vpack.c.bf16 %v2407_v6, %v2409_v12 }
 0x2bd   : > { %2209 = vmatpush1.bf16.msra.mxu1 %v2208_v49 }
 0x2be   : > { %v2411_v54 = vpop.eup %2410  ;;  %2040 = vmatmul.mubr.msk.f32.vlgmr.msra.gmra.mrb[20].mxu0 %vm698_vm0, %v2032_v7  ;;  %2211 = vmatprep.subr.bf16.mxu0 %v2210_v52 }
 0x2bf   : > { %v2413_v62 = vpop.eup %2412  ;;  %2213 = vmatpush3.bf16.msra.mxu0 %v2210_v52  ;;  %1431 = vmatprep.mubr.f32.mxu0 %v3001_v32 }
 0x2c0   : > { %2044 = vmatmul.mubr.msk.f32.vlgmr.msra.gmra.mrb[20].mxu1 %vm698_vm0, %v2032_v7  ;;  %v2214_v14 = vpack.c.bf16 %v2411_v54, %v2413_v62 }
 0x2c1   : > { %1520 = vmatprep.mubr.f32.mxu1 %v3001_v32 }
 0x2c2   : > { %2041 = vmatmul.mubr.msk.f32.gmra.mrb[22].mxu0 %vm698_vm0, %v2033_v13  ;;  %2215 = vmatprep.subr.bf16.mxu0 %v2214_v14 }
 0x2c3   : > { %2217 = vmatpush3.bf16.msra.mxu0 %v2214_v14  ;;  %1437 = vmatprep.mubr.f32.mxu0 %v3001_v32 }
 0x2c4   : > { %2045 = vmatmul.mubr.msk.f32.gmra.mrb[22].mxu1 %vm698_vm0, %v2033_v13 }
 0x2c5   : > { %1526 = vmatprep.mubr.f32.mxu1 %v3001_v32 }
 0x2c6   : > { %2042 = vmatmul.mubr.msk.f32.gmra.mrb[24].mxu0 %vm698_vm0, %v2034_v18 }
 0x2c7   : > { %1443 = vmatprep.mubr.f32.mxu0 %v3001_v32 }
 0x2c8   : > { %2046 = vmatmul.mubr.msk.f32.gmra.mrb[24].mxu1 %vm698_vm0, %v2034_v18 }
 0x2c9   : > { %1532 = vmatprep.mubr.f32.mxu1 %v3001_v32 }
 0x2ca   : > { %2043 = vmatmul.mubr.msk.f32.gmra.mrb[26].mxu0 %vm698_vm0, %v2035_v21 }
 0x2cb   : > { %2129 = vmatprep.mubr.msk.f32.mxu0 %vm698_vm0, %v2032_v7 }
 0x2cc   : > { %2047 = vmatmul.mubr.msk.f32.gmra.mrb[26].mxu1 %vm698_vm0, %v2035_v21 }
 0x2cd   : > { %1718 = vmatprep.mubr.f32.mxu1 %v3001_v32 }
 0x2ce   : > { %2130 = vmatmul.mubr.msk.f32.vlgmr.msra.gmra.mrb[28].mxu0 %vm698_vm0, %v2033_v13 }
 0x2cf   : > { %2132 = vmatprep.mubr.msk.f32.mxu0 %vm698_vm0, %v2034_v18 }
 0x2d2   : > { %2133 = vmatmul.mubr.msk.f32.gmra.mrb[30].mxu0 %vm698_vm0, %v2035_v21 }
 0x2d3   : > { %1789 = vmatprep.mubr.f32.mxu0 %v3001_v32 }
 0x391   : > { %v1427_v51 = vpop.f32.mrb[20].mxu0 }
 0x392   : > { %v1428_v19 = vadd.f32 %v1427_v51, %v1332_v57  ;;  %v1429_v22 = vpop.f32.mrb[21].mxu0 }
 0x393   : > { %v1516_v8 = vpop.f32.mrb[20].mxu1  ;;  %v1430_v55 = vadd.f32 %v1429_v22, %v1332_v57 }
 0x394   : > { %2414 = vtanh.f32 %v1428_v19  ;;  %v1517_v26 = vadd.f32 %v1516_v8, %v1332_v57  ;;  %v1518_v56 = vpop.f32.mrb[21].mxu1 }
 0x395   : > { %2416 = vtanh.f32 %v1430_v55  ;;  %v1519_v28 = vadd.f32 %v1518_v56, %v1332_v57  ;;  %v1433_v29 = vpop.f32.mrb[22].mxu0  ;;  %v1644_v56 = vld [vmem:[%s2984_s7] sm:$0x7] }
 0x396   : > { %2418 = vtanh.f32 %v1517_v26  ;;  %v1434_v50 = vadd.f32 %v1433_v29, %v1337_v23  ;;  %v1435_v20 = vpop.f32.mrb[23].mxu0 }
 0x397   : > { %2420 = vtanh.f32 %v1519_v28  ;;  %v1522_v24 = vpop.f32.mrb[22].mxu1  ;;  %v1436_v17 = vadd.f32 %v1435_v20, %v1337_v23 }
 0x398   : > { %2422 = vtanh.f32 %v1434_v50  ;;  %v1523_v16 = vadd.f32 %v1522_v24, %v1337_v23  ;;  %v1524_v38 = vpop.f32.mrb[23].mxu1  ;;  %v1649_v24 = vpop.permute.xlu0 %1648 }
 0x399   : > { %2424 = vtanh.f32 %v1436_v17  ;;  %v1525_v25 = vadd.f32 %v1524_v38, %v1337_v23  ;;  %v1439_v31 = vpop.f32.mrb[24].mxu0 }
 0x39a   : > { %2426 = vtanh.f32 %v1523_v16  ;;  %v1440_v48 = vadd.f32 %v1439_v31, %v1342_v63  ;;  %v1441_v27 = vpop.f32.mrb[25].mxu0 }
 0x39b   : > { %2428 = vtanh.f32 %v1525_v25  ;;  %v1528_v30 = vpop.f32.mrb[24].mxu1  ;;  %v1442_v40 = vadd.f32 %v1441_v27, %v1342_v63 }
 0x39c   : > { %2430 = vtanh.f32 %v1440_v48  ;;  %v1529_v35 = vadd.f32 %v1528_v30, %v1342_v63  ;;  %v1530_v41 = vpop.f32.mrb[25].mxu1 }
 0x39d   : > { %2432 = vtanh.f32 %v1442_v40  ;;  %v1531_v42 = vadd.f32 %v1530_v41, %v1342_v63  ;;  %v1445_v0 = vpop.f32.mrb[26].mxu0 }
 0x39e   : > { %v2415_v43 = vpop.eup %2414  ;;  %2434 = vtanh.f32 %v1529_v35  ;;  %v1446_v1 = vadd.f32 %v1445_v0, %v1347_v36  ;;  %v1447_v33 = vpop.f32.mrb[27].mxu0 }
 0x39f   : > { %v2417_v37 = vpop.eup %2416  ;;  %2436 = vtanh.f32 %v1531_v42  ;;  %v1534_v39 = vpop.f32.mrb[26].mxu1  ;;  %v1448_v44 = vadd.f32 %v1447_v33, %v1347_v36 }
 0x3a0   : > { %v2419_v53 = vpop.eup %2418  ;;  %2438 = vtanh.f32 %v1446_v1  ;;  %v1535_v3 = vadd.f32 %v1534_v39, %v1347_v36  ;;  %v1536_v34 = vpop.f32.mrb[27].mxu1 }
 0x3a1   : > { %v2421_v46 = vpop.eup %2420  ;;  %2440 = vtanh.f32 %v1448_v44  ;;  %v1537_v10 = vadd.f32 %v1536_v34, %v1347_v36  ;;  %v2131_v58 = vpop.f32.mrb[28].mxu0 }
 0x3a2   : > { %v2423_v9 = vpop.eup %2422  ;;  %2442 = vtanh.f32 %v1535_v3  ;;  %v1611_v47 = vadd.f32 %v2131_v58, %v1337_v23  ;;  %v1605_v59 = vpop.f32.mrb[29].mxu0  ;;  %v2542_v23 = vmov 0.0|0.0  }
 0x3a3   : > { %v2425_v60 = vpop.eup %2424  ;;  %2444 = vtanh.f32 %v1537_v10  ;;  %v1606_v15 = vadd.f32 %v1605_v59, %v1332_v57  ;;  %v2220_v61 = vpack.c.bf16 %v2423_v9, %v2415_v43 }
 0x3a4   : > { %v2427_v11 = vpop.eup %2426  ;;  %2446 = vtanh.f32 %v1611_v47  ;;  %v2218_v45 = vpack.c.bf16 %v2425_v60, %v2417_v37 }
 0x3a5   : > { %v2429_v4 = vpop.eup %2428  ;;  %2448 = vtanh.f32 %v1606_v15  ;;  %v2134_v5 = vpop.f32.mrb[30].mxu0  ;;  %v2228_v49 = vpack.c.bf16 %v2427_v11, %v2419_v53 }
 0x3a6   : > { %v2431_v6 = vpop.eup %2430  ;;  %v1621_v2 = vadd.f32 %v2134_v5, %v1347_v36  ;;  %v1615_v12 = vpop.f32.mrb[31].mxu0  ;;  %2219 = vmatprep.subr.bf16.mxu1 %v2218_v45  ;;  %v2226_v7 = vpack.c.bf16 %v2429_v4, %v2421_v46 }
 0x3a7   : > { %v2433_v52 = vpop.eup %2432  ;;  %v1616_v54 = vadd.f32 %v1615_v12, %v1342_v63  ;;  %2221 = vmatpush1.bf16.msra.mxu1 %v2220_v61 }
 0x3a8   : > { %v2435_v62 = vpop.eup %2434  ;;  %2450 = vtanh.f32 %v1621_v2  ;;  %2227 = vmatprep.subr.bf16.mxu0 %v2226_v7 }
 0x3a9   : > { %v2437_v13 = vpop.eup %2436  ;;  %2452 = vtanh.f32 %v1616_v54  ;;  %2229 = vmatpush1.bf16.msra.mxu0 %v2228_v49 }
 0x3aa   : > { %v2439_v14 = vpop.eup %2438 }
 0x3ab   : > { %v2441_v18 = vpop.eup %2440  ;;  %v2224_v21 = vpack.c.bf16 %v2439_v14, %v2431_v6 }
 0x3ac   : > { %v2443_v57 = vpop.eup %2442  ;;  %v2222_v51 = vpack.c.bf16 %v2441_v18, %v2433_v52 }
 0x3ad   : > { %v2445_v19 = vpop.eup %2444  ;;  %v2232_v22 = vpack.c.bf16 %v2443_v57, %v2435_v62 }
 0x3ae   : > { %v2447_v8 = vpop.eup %2446  ;;  %2223 = vmatprep.subr.bf16.mxu1 %v2222_v51  ;;  %v2230_v55 = vpack.c.bf16 %v2445_v19, %v2437_v13 }
 0x3af   : > { %v2449_v26 = vpop.eup %2448  ;;  %2225 = vmatpush1.bf16.msra.mxu1 %v2224_v21 }
 0x3b0   : > { %2231 = vmatprep.subr.bf16.mxu0 %v2230_v55  ;;  %2234 = vmatprep.subr.bf16.mxu1 %v2542_v23  ;;  %v2235_v28 = vpack.c.bf16 %v2447_v8, %v2449_v26 }
 0x3b1   : > { %2233 = vmatpush1.bf16.msra.mxu0 %v2232_v22 }
 0x3b2   : > { %v2451_v29 = vpop.eup %2450  ;;  %2052 = vmatmul.mubr.msk.f32.vlgmr.msra.gmra.mrb[28].mxu1 %vm698_vm0, %v1644_v56 }
 0x3b3   : > { %v2453_v50 = vpop.eup %2452  ;;  %2236 = vmatpush3.bf16.msra.mxu1 %v2235_v28  ;;  %2143 = vmatprep.mubr.msk.f32.mxu1 %vm2543_vm1, %v3001_v32 }
 0x3b4   : > { %2053 = vmatmul.mubr.msk.f32.vlgmr.msra.gmra.mrb[32].mxu0 %vm698_vm0, %v1644_v56  ;;  %2237 = vmatprep.subr.bf16.mxu1 %v2542_v23  ;;  %v2238_v20 = vpack.c.bf16 %v2451_v29, %v2453_v50 }
 0x3b7   : > { %2239 = vmatpush3.bf16.msra.mxu1 %v2238_v20 }
 0x3ba   : > { %2144 = vmatmul.mubr.msk.f32.vlgmr.msra.gmra.mrb[30].mxu1 %vm698_vm0, %v1644_v56 }
 0x485   : > { %v1720_v17 = vpop.f32.mrb[28].mxu1 }
 0x486   : > { %v1721_v16 = vadd.f32 %v1720_v17, %v1649_v24  ;;  %v1722_v38 = vpop.f32.mrb[29].mxu1 }
 0x487   : > { %v1791_v63 = vpop.f32.mrb[32].mxu0  ;;  %v1723_v25 = vadd.f32 %v1722_v38, %v1649_v24 }
 0x488   : > { %v2055_v31 = vmul.f32 -1.442695, %v1721_v16  ;;  %v1792_v48 = vadd.f32 %v1791_v63, %v1649_v24  ;;  %v1793_v27 = vpop.f32.mrb[33].mxu0 }
 0x489   : > { %v2056_v30 = vmul.f32 -1.442695, %v1723_v25  ;;  %v1794_v40 = vadd.f32 %v1793_v27, %v1649_v24 }
 0x48a   : > { %2454 = vpow2.f32 %v2055_v31  ;;  %v2057_v32 = vmul.f32 -1.442695, %v1792_v48 }
 0x48b   : > { %2456 = vpow2.f32 %v2056_v30  ;;  %v2058_v35 = vmul.f32 -1.442695, %v1794_v40 }
 0x48c   : > { %2458 = vpow2.f32 %v2057_v32 }
 0x48d   : > { %2460 = vpow2.f32 %v2058_v35  ;;  %v1862_v41 = vpop.f32.mrb[30].mxu1 }
 0x48e   : > { %v1863_v36 = vadd.f32 %v1862_v41, %v1649_v24  ;;  %v2145_v42 = vpop.f32.mrb[31].mxu1 }
 0x490   : > { %v2059_v0 = vmul.f32 -1.442695, %v1863_v36 }
 0x492   : > { %2462 = vpow2.f32 %v2059_v0 }
 0x494   : > { %v2455_v43 = vpop.eup %2454 }
 0x495   : > { %v2457_v1 = vpop.eup %2456  ;;  %v1881_v33 = vadd.f32 1.0, %v2455_v43 }
 0x496   : > { %v2459_v37 = vpop.eup %2458  ;;  %v1882_v39 = vadd.f32 1.0, %v2457_v1 }
 0x497   : > { %v2461_v44 = vpop.eup %2460  ;;  %2464 = vrcp.f32 %v1881_v33  ;;  %v1883_v53 = vadd.f32 1.0, %v2459_v37 }
 0x498   : > { %2466 = vrcp.f32 %v1882_v39  ;;  %v1884_v3 = vadd.f32 1.0, %v2461_v44 }
 0x499   : > { %2468 = vrcp.f32 %v1883_v53 }
 0x49a   : > { %2470 = vrcp.f32 %v1884_v3 }
 0x49c   : > { %v2463_v34 = vpop.eup %2462 }
 0x49d   : > { %v1885_v46 = vadd.f32 1.0, %v2463_v34 }
 0x49f   : > { %2472 = vrcp.f32 %v1885_v46 }
 0x4a1   : > { %v2465_v10 = vpop.eup %2464 }
 0x4a2   : > { %v2467_v58 = vpop.eup %2466 }
 0x4a3   : > { %v2469_v9 = vpop.eup %2468  ;;  %v1900_v47 = vcombine.low %v2465_v10, %v2467_v58 }
 0x4a4   : > { %v2471_v59 = vpop.eup %2470 }
 0x4a5   : > { %v1901_v60 = vcombine.low %v2469_v9, %v2471_v59  ;;  %1904 = vst [vmem:[%s352_s14] sm:$0x77] %v1900_v47 }
 0x4a7   : > { %1905 = vst [vmem:[%s352_s14 + $0x8] sm:$0x77] %v1901_v60 }
 0x4a9   : > { %v2473_v15 = vpop.eup %2472 }
 0x4aa   : > { %1906 = vst [vmem:[%s352_s14 + $0x10] sm:$0x7] %v2473_v15 }
 0x4ab   : > { %2487 = shalt.err (!%p2484_p3)
}
 0x4ac   : > { %s2488_s27 = scalar_lea.hbm %s2935_s22, 320  ;;  %s2492_s14 = scalar_lea.hbm %s2986_s9, 640 }
 0x4ad   : > { %p2489_p4 = scmp.ne.s32.totalorder %s2935_s22, %s2488_s27  ;;  %p2493_p9 = scmp.lt.u32.totalorder %s2935_s22, %s2986_s9 }
 0x4ae   : > { %p2494_p10 = scmp.lt.u32.totalorder %s2492_s14, %s2488_s27  ;;  %p2496_p12 = scmp.lt.u32.totalorder %s2488_s27, %s2935_s22 }
 0x4af   : > { %p2490_p7 = pnand %p2489_p4, %p2633_p5 }
 0x4b0   : > { %p2495_p11 = por %p2494_p10, %p2493_p9 }
 0x4b1   : > { %p2491_p8 = pneg %p2490_p7 }
 0x4b2   : > { %p2497_p13 = por %p2496_p12, %p2495_p11 }
 0x4b4   : > { %p2498_p0 = pnand %p2497_p13, %p2491_p8 }
 0x4b6   : > { %2501 = shalt.err (!%p2498_p0)
}
 0x4b7   : > { %2241 = dma.vmem_to_hbm [thread:$0]  (%p2633_p5), %s2937_s16, 320, %s2935_s22, %s1908_s23  }
 0x4b8 PF: > { %p2247_p1 = scmp.ge.s32.totalorder %s2536_s12, 2  ;;  %s1934_s24 = sand.u32 1, %s2524_s30  }
 0x4b9   : > { %s1935_s13 = scalar_lea.sflag [#allocation3], %s1934_s24 }
 0x4ba   : > { %p2244_p2 = pnand %p2247_p1, %p2637_p6 }
 0x4bc   : > { %2519 = dma.done.wait (!%p2244_p2), %s1935_s13, 320  }
 0x4bd   : > { %2521 = vsyncadd (!%p2244_p2), %s1935_s13, 4294966976  ;;  %p19_p3 = scmp.ge.s32.totalorder %s2620_s15, 4   ;;  %s3002_s30 = smov %s2528_s10 }
 0x4be   : > { %s3003_s10 = smov %s2532_s11  ;;  %s3004_s11 = smov %s2631_s18 }
 0x4bf   : > { %s3005_s12 = smov %s2620_s15  ;;  %21 = sbr.rel (!%p19_p3) target bundleno = 3 (0x3), region = 101 }
 0x4c6   :  { %1940 = vsyncpa [#allocation3], 1 }
 0x4c7   :  { %1942 = vsyncpa [#allocation3 + $0x1], 1 }

</bundles_post_ra>
